<compile_context>
chip_gen: v7x
topology: tpu7x:2x2x1
jax: 0.10.0
libtpu: 0.0.40
codegen_flags: <defaults>
</compile_context>

<pallas_src>
import functools

import jax
import jax.numpy as jnp
from jax import lax
from jax.experimental import pallas as pl
from jax.experimental.pallas import tpu as pltpu


def _round_up(x: int, m: int) -> int:
    return (x + m - 1) // m * m


def _gce_tile_kernel(logits_ref, tgt_ref, out_ref, *, q: float, n_valid: int,
                     tn: int):
    pid = pl.program_id(0)

    x = logits_ref[...].astype(jnp.float32)              # (TN, C)
    t = tgt_ref[...]                                      # (TN, 1) int32

    # Row-wise stable log-sum-exp; exp(x - m) is the only (TN, C) EUP op.
    m = jnp.max(x, axis=-1, keepdims=True)                # (TN, 1)
    lse = m + jnp.log(jnp.sum(jnp.exp(x - m), axis=-1, keepdims=True))

    # Target-class logit via one-hot select (no dynamic gather on TPU).
    cls = lax.broadcasted_iota(jnp.int32, x.shape, 1)
    x_t = jnp.sum(jnp.where(cls == t, x, 0.0), axis=-1, keepdims=True)

    if q == 0.0:
        # Plain cross-entropy / BCE-with-logits per row.
        per_row = lse - x_t                                # (TN, 1)
    else:
        # p_t**q = exp(q * log p_t) = exp(q * (x_t - lse))  (per-row)
        ptq = jnp.exp(jnp.float32(q) * (x_t - lse))
        per_row = (1.0 - ptq) * jnp.float32(1.0 / q)       # (TN, 1)

    # Mask rows beyond the true batch size (the edge tile reads undefined
    # rows; the where-select discards any NaN/Inf they might produce).
    row = pid * tn + lax.broadcasted_iota(jnp.int32, per_row.shape, 0)
    per_row = jnp.where(row < n_valid, per_row, 0.0)

    # Lane-dense partial-sum block for this tile.
    out_ref[...] = jnp.full((1, 8, 128), jnp.sum(per_row), dtype=jnp.float32)


def gce_loss(logits: jax.Array, targets: jax.Array, q: float = 0.7,
             block_rows: int | None = None) -> jax.Array:
    q = float(q)
    n, c = logits.shape
    orig_c = c

    if c == 1:
        # Binary head: cat(1 - sigmoid(x), sigmoid(x)) == softmax([0, x], -1),
        # and BCEWithLogits(x, t) == CE on [0, x]; reuse the same kernel.
        logits = jnp.concatenate([jnp.zeros_like(logits), logits], axis=-1)
        c = 2

    tgt = targets.astype(jnp.int32).reshape(n, 1)

    itemsize = jnp.dtype(logits.dtype).itemsize
    sub = {4: 8, 2: 16, 1: 32}.get(itemsize, 8)            # sublane granularity

    # Only tiny batches (< one sublane group) ever get padded in HBM.
    n_rows = n
    if n_rows < sub:
        pad = sub - n_rows
        logits = jnp.pad(logits, ((0, pad), (0, 0)))
        tgt = jnp.pad(tgt, ((0, pad), (0, 0)))
        n_rows = sub

    if block_rows is None:
        # Aim for ~2 MiB of logits per tile (good DMA / pipeline granularity).
        target_bytes = 2 << 20
        block_rows = max(sub, target_bytes // max(1, c * itemsize))
    tn = max(sub, min(_round_up(block_rows, sub), (n_rows // sub) * sub))
    grid = pl.cdiv(n_rows, tn)

    # Double-buffered input tiles + tiny output tile, with headroom.
    tile_bytes = tn * c * itemsize + tn * 4 + 8 * 128 * 4
    vmem_limit = int(min(64 << 20, max(16 << 20, 4 * tile_bytes + (1 << 20))))

    partials = pl.pallas_call(
        functools.partial(_gce_tile_kernel, q=q, n_valid=n, tn=tn),
        out_shape=jax.ShapeDtypeStruct((grid, 8, 128), jnp.float32),
        grid=(grid,),
        in_specs=[
            pl.BlockSpec((tn, c), lambda i: (i, 0)),
            pl.BlockSpec((tn, 1), lambda i: (i, 0)),
        ],
        out_specs=pl.BlockSpec((1, 8, 128), lambda i: (i, 0, 0)),
        compiler_params=pltpu.CompilerParams(
            dimension_semantics=("parallel",),
            vmem_limit_bytes=vmem_limit,
        ),
    )(logits, tgt)

    total = jnp.sum(partials[:, 0, 0])

    if q == 0.0:
        if orig_c == 1:
            return total / jnp.float32(n)          # BCE 'none' -> sum / n
        return total / jnp.float32(n * n)          # CE 'mean'  -> (sum/n) / n
    return total / jnp.float32(n)


def _gce_loss_ref(logits, targets, q=0.7):
    logits = logits.astype(jnp.float32)
    n = logits.shape[0]
    tgt_i = targets.astype(jnp.int32)
    if q == 0:
        if logits.shape[-1] == 1:
            x = logits.reshape(-1)
            t = targets.astype(jnp.float32)
            loss = jnp.maximum(x, 0.0) - x * t + jnp.log1p(jnp.exp(-jnp.abs(x)))
            return loss.sum() / n
        logp = jax.nn.log_softmax(logits, axis=-1)
        ce = -jnp.take_along_axis(logp, tgt_i[:, None], axis=-1)
        return ce.mean() / n
    if logits.shape[-1] == 1:
        p = jax.nn.sigmoid(logits)
        pred = jnp.concatenate([1.0 - p, p], axis=-1)
    else:
        pred = jax.nn.softmax(logits, axis=-1)
    p_t = jnp.take_along_axis(pred, tgt_i[:, None], axis=-1)
    loss = (1.0 - p_t ** q) / q
    return loss.reshape(-1).sum() / n


if __name__ == "__main__":
    key = jax.random.PRNGKey(0)
    k1, k2, k3, k4, k5, k6, k7, k8 = jax.random.split(key, 8)

    # Case 1: small multiclass (single tile), f32.
    n1, c1 = 8, 32
    logits1 = jax.random.normal(k1, (n1, c1), dtype=jnp.float32)
    tgt1 = jax.random.randint(k2, (n1,), 0, c1, dtype=jnp.int32)
    out1 = jax.block_until_ready(gce_loss(logits1, tgt1, q=0.7))
    ref1 = _gce_loss_ref(logits1, tgt1, q=0.7)
    assert jnp.allclose(out1, ref1, rtol=1e-4, atol=1e-5), (out1, ref1)

    # Case 2: multi-tile grid with a partial (masked) edge tile, bf16 logits.
    n2, c2 = 200, 128
    logits2 = jax.random.normal(k3, (n2, c2), dtype=jnp.float32).astype(jnp.bfloat16)
    tgt2 = jax.random.randint(k4, (n2,), 0, c2, dtype=jnp.int32)
    out2 = jax.block_until_ready(gce_loss(logits2, tgt2, q=0.7, block_rows=64))
    ref2 = _gce_loss_ref(logits2.astype(jnp.float32), tgt2, q=0.7)
    assert jnp.allclose(out2, ref2, rtol=1e-4, atol=1e-4), (out2, ref2)

    # Case 3: binary head (C == 1), sigmoid + concat path.
    n3 = 16
    logits3 = jax.random.normal(k5, (n3, 1), dtype=jnp.float32)
    tgt3 = jax.random.randint(k6, (n3,), 0, 2, dtype=jnp.int32)
    out3 = jax.block_until_ready(gce_loss(logits3, tgt3, q=0.7))
    ref3 = _gce_loss_ref(logits3, tgt3, q=0.7)
    assert jnp.allclose(out3, ref3, rtol=1e-4, atol=1e-5), (out3, ref3)

    # Case 4: q == 0 multiclass (CrossEntropy mean, then / n).
    n4, c4 = 24, 16
    logits4 = jax.random.normal(k7, (n4, c4), dtype=jnp.float32)
    tgt4 = jax.random.randint(k8, (n4,), 0, c4, dtype=jnp.int32)
    out4 = jax.block_until_ready(gce_loss(logits4, tgt4, q=0.0))
    ref4 = _gce_loss_ref(logits4, tgt4, q=0.0)
    assert jnp.allclose(out4, ref4, rtol=1e-4, atol=1e-5), (out4, ref4)

    # Case 5: q == 0 binary head (BCEWithLogits 'none', sum / n).
    out5 = jax.block_until_ready(gce_loss(logits3, tgt3, q=0.0))
    ref5 = _gce_loss_ref(logits3, tgt3, q=0.0)
    assert jnp.allclose(out5, ref5, rtol=1e-4, atol=1e-5), (out5, ref5)

    print("KERNEL_OK")
</pallas_src>

<mosaic_0001>
module attributes {stable_mosaic.version = 11 : i64} {
  func.func @_gce_tile_kernel(%arg0: i32, %arg1: memref<8x32xf32, #tpu.memory_space<vmem>>, %arg2: memref<8x1xi32, #tpu.memory_space<vmem>>, %arg3: memref<1x8x128xf32, #tpu.memory_space<vmem>>) attributes {dimension_semantics = [#tpu.dimension_semantics<parallel>], iteration_bounds = array<i64: 1>, scalar_prefetch = 0 : i64, scratch_operands = 0 : i64, tpu.core_type = #tpu.core_type<tc>, window_params = [{transform_indices = @transform_0, window_bounds = array<i64: 8, 32>}, {transform_indices = @transform_1, window_bounds = array<i64: 8, 1>}, {transform_indices = @transform_2, window_bounds = array<i64: 1, 8, 128>}]} {
    %c0 = arith.constant 0 : index
    %c0_0 = arith.constant 0 : index
    %0 = vector.load %arg1[%c0, %c0_0] : memref<8x32xf32, #tpu.memory_space<vmem>>, vector<8x32xf32>
    %c0_1 = arith.constant 0 : index
    %c0_2 = arith.constant 0 : index
    %1 = vector.load %arg2[%c0_1, %c0_2] : memref<8x1xi32, #tpu.memory_space<vmem>>, vector<8x1xi32>
    %cst = arith.constant dense<0xFF800000> : vector<8xf32>
    %2 = vector.multi_reduction <maximumf>, %0, %cst [1] : vector<8x32xf32> to vector<8xf32>
    %3 = vector.shape_cast %2 : vector<8xf32> to vector<8x1xf32>
    %4 = vector.broadcast %3 : vector<8x1xf32> to vector<8x32xf32>
    %5 = arith.subf %0, %4 : vector<8x32xf32>
    %6 = math.exp %5 : vector<8x32xf32>
    %cst_3 = arith.constant dense<0.000000e+00> : vector<8xf32>
    %7 = vector.multi_reduction <add>, %6, %cst_3 [1] : vector<8x32xf32> to vector<8xf32>
    %8 = vector.shape_cast %7 : vector<8xf32> to vector<8x1xf32>
    %9 = math.log %8 : vector<8x1xf32>
    %10 = arith.addf %3, %9 : vector<8x1xf32>
    %11 = tpu.iota {dimensions = array<i32: 1>} : vector<8x32xi32>
    %12 = vector.broadcast %1 : vector<8x1xi32> to vector<8x32xi32>
    %13 = arith.cmpi eq, %11, %12 : vector<8x32xi32>
    %cst_4 = arith.constant 0.000000e+00 : f32
    %14 = vector.broadcast %cst_4 : f32 to vector<8x32xf32>
    %15 = arith.select %13, %0, %14 : vector<8x32xi1>, vector<8x32xf32>
    %cst_5 = arith.constant dense<0.000000e+00> : vector<8xf32>
    %16 = vector.multi_reduction <add>, %15, %cst_5 [1] : vector<8x32xf32> to vector<8xf32>
    %17 = vector.shape_cast %16 : vector<8xf32> to vector<8x1xf32>
    %18 = arith.subf %17, %10 : vector<8x1xf32>
    %cst_6 = arith.constant 0.699999988 : f32
    %19 = vector.broadcast %cst_6 : f32 to vector<8x1xf32>
    %20 = arith.mulf %19, %18 : vector<8x1xf32>
    %21 = math.exp %20 : vector<8x1xf32>
    %cst_7 = arith.constant 1.000000e+00 : f32
    %22 = vector.broadcast %cst_7 : f32 to vector<8x1xf32>
    %23 = arith.subf %22, %21 : vector<8x1xf32>
    %cst_8 = arith.constant 1.42857146 : f32
    %24 = vector.broadcast %cst_8 : f32 to vector<8x1xf32>
    %25 = arith.mulf %23, %24 : vector<8x1xf32>
    %c8_i32 = arith.constant 8 : i32
    %26 = arith.muli %arg0, %c8_i32 : i32
    %27 = tpu.iota {dimensions = array<i32: 0>} : vector<8x1xi32>
    %28 = vector.broadcast %26 : i32 to vector<8x1xi32>
    %29 = arith.addi %28, %27 : vector<8x1xi32>
    %c8_i32_9 = arith.constant 8 : i32
    %30 = vector.broadcast %c8_i32_9 : i32 to vector<8x1xi32>
    %31 = arith.cmpi slt, %29, %30 : vector<8x1xi32>
    %cst_10 = arith.constant 0.000000e+00 : f32
    %32 = vector.broadcast %cst_10 : f32 to vector<8x1xf32>
    %33 = arith.select %31, %25, %32 : vector<8x1xi1>, vector<8x1xf32>
    %34 = vector.shape_cast %33 : vector<8x1xf32> to vector<1x8x1xf32>
    %cst_11 = arith.constant dense<0.000000e+00> : vector<1xf32>
    %35 = vector.multi_reduction <add>, %34, %cst_11 [1, 2] : vector<1x8x1xf32> to vector<1xf32>
    %36 = vector.shape_cast %35 : vector<1xf32> to vector<1x1x1xf32>
    %37 = vector.extract %36[0, 0, 0] : f32 from vector<1x1x1xf32>
    %38 = vector.broadcast %37 : f32 to vector<1x8x128xf32>
    %c0_12 = arith.constant 0 : index
    %c0_13 = arith.constant 0 : index
    %c0_14 = arith.constant 0 : index
    %39 = vector.load %arg3[%c0_12, %c0_13, %c0_14] : memref<1x8x128xf32, #tpu.memory_space<vmem>>, vector<1x8x128xf32>
    tpu.vector_store %arg3[%c0_12, %c0_13, %c0_14], %38 {strides = array<i32>} : memref<1x8x128xf32, #tpu.memory_space<vmem>>, vector<1x8x128xf32>,
    return
  }
  func.func @transform_0(%arg0: i32) -> (i32, i32) {
    %c0_i32 = arith.constant 0 : i32
    %c0_i32_0 = arith.constant 0 : i32
    return %arg0, %c0_i32 : i32, i32
  }
  func.func @transform_1(%arg0: i32) -> (i32, i32) {
    %c0_i32 = arith.constant 0 : i32
    %c0_i32_0 = arith.constant 0 : i32
    return %arg0, %c0_i32 : i32, i32
  }
  func.func @transform_2(%arg0: i32) -> (i32, i32, i32) {
    %c0_i32 = arith.constant 0 : i32
    %c0_i32_0 = arith.constant 0 : i32
    %c0_i32_1 = arith.constant 0 : i32
    return %arg0, %c0_i32, %c0_i32_0 : i32, i32, i32
  }
}

</mosaic_0001>

<bundles_post_ra>
// kernel: tpu_custom_call.1
= control target key start
LH: loop header
LB: loop body
LE: loop exit
PB: predicated region body
PF: predicated region fallthrough
CT: control target
= control target key end

     0   :  { %vm14_vm0 = vcmask 261120   ;;  %s150_s0 = inlined_call_operand.vmem [shape: f32[8,32], index: 0, kind: input, shape index: {}]   ;;  %s151_s1 = inlined_call_operand.vmem [shape: s32[8,1], index: 1, kind: input, shape index: {}]   ;;  %s152_s2 = inlined_call_operand.hbm [shape: f32[1,8,128], index: 2, kind: output, shape index: {}]  }
   0x1   :  { %v12_v0 = vld [vmem:[%s150_s0] sm:$0xff] }
   0x2   :  { %7 = vsyncpa [#allocation3], 0  ;;  %v15_v1 = vsel %vm14_vm0, %v12_v0, -inf  ;;  %v112_v2 = vmov 0   ;;  %v13_v3 = vld [vmem:[%s151_s1] sm:$0xff]  ;;  %v27_v7 = vlaneseq  ;;  %vm50_vm2 = vcmask 7168  }
   0x3   :  { %81 = vset.pattern.permute.xlu0 %v112_v2  ;;  %s113_s0 = smov [#allocation2]  }
   0x4   :  { %16 = vmax.xlane.f32.xlu0 %v15_v1  ;;  %v28_v8 = vand.u32 127, %v27_v7  ;;  %s69_s1 = sshll.u32 %s113_s0, 4  ;;  %s70_s1 = int_to_ptr.vmem [resolvable:$true] %s69_s1 }
   0x5   :  { %s88_s14 = scalar_lea.vmem %s70_s1, 128  ;;  %p93_p1 = scmp.lt.s32.totalorder %s70_s1, %s70_s1 }
   0x6   :  { %p89_p0 = scmp.ne.s32.totalorder %s70_s1, %s88_s14  ;;  %p94_p2 = scmp.lt.s32.totalorder %s88_s14, %s88_s14 }
   0x8   :  { %p95_p3 = por %p94_p2, %p93_p1 }
   0xa   :  { %p96_p4 = pnand %p95_p3, %p89_p0 }
  0x1a   :  { %30 = vperm.xlu0 %81, %v13_v3  }
  0x91   :  { %v17_v4 = vpop.xlane.xlu0 %16 }
  0x92   :  { %v18_v5 = vsub.f32 %v12_v0, %v17_v4 }
  0x94   :  { %v19_v6 = vmul.f32 1.442695, %v18_v5 }
  0x96   :  { %82 = vpow2.f32 %v19_v6 }
  0x99   :  { %v31_v9 = vpop.permute.xlu0 %30 }
  0x9a   :  { %vm32_vm1 = vcmp.eq.s32.totalorder %v28_v8, %v31_v9 }
  0x9b   :  { %v33_v11 = vsel %vm32_vm1, %v12_v0, 0.0 }
  0x9c   :  { %v34_v13 = vsel %vm14_vm0, %v33_v11, 0.0 }
  0xa0   :  { %v83_v10 = vpop.eup %82 }
  0xa1   :  { %v21_v12 = vsel %vm14_vm0, %v83_v10, 0.0 }
  0xa2   :  { %22 = vadd.xlane.f32.xlu1 %v21_v12 }
  0xa6   :  { %35 = vadd.xlane.f32.xlu1 %v34_v13 }
 0x12f   :  { %v23_v14 = vpop.xlane.xlu1 %22 }
 0x130   :  { %84 = vlog2.f32 %v23_v14 }
 0x133   :  { %v36_v17 = vpop.xlane.xlu1 %35 }
 0x13a   :  { %v85_v15 = vpop.eup %84 }
 0x13b   :  { %v25_v16 = vmul.f32 0.6931472, %v85_v15 }
 0x13d   :  { %v26_v18 = vadd.f32 %v25_v16, %v17_v4 }
 0x13f   :  { %v37_v19 = vsub.f32 %v36_v17, %v26_v18 }
 0x141   :  { %v38_v20 = vmul.f32 0.7, %v37_v19 }
 0x143   :  { %v39_v21 = vmul.f32 1.442695, %v38_v20 }
 0x145   :  { %86 = vpow2.f32 %v39_v21 }
 0x14f   :  { %v87_v22 = vpop.eup %86 }
 0x150   :  { %v41_v23 = vsub.f32 1.0, %v87_v22 }
 0x152   :  { %v42_v24 = vmul.f32 1.4285715, %v41_v23 }
 0x154   :  { %v51_v25 = vsel %vm50_vm2, %v42_v24, 0.0 }
 0x155   :  { %52 = vadd.xlane.f32.xlu1 %v51_v25 }
 0x1e2   :  { %v53_v26 = vpop.xlane.xlu1 %52 }
 0x1e3   :  { %v54_v27 = vrot.slane %v53_v26, 4 }
 0x1e5   :  { %v55_v28 = vadd.f32 %v54_v27, %v53_v26 }
 0x1e7   :  { %v56_v29 = vrot.slane %v55_v28, 2 }
 0x1e9   :  { %v57_v30 = vadd.f32 %v56_v29, %v55_v28 }
 0x1eb   :  { %v58_v31 = vrot.slane %v57_v30, 1 }
 0x1ed   :  { %v59_v32 = vadd.f32 %v58_v31, %v57_v30 }
 0x1ef   :  { %77 = vpush %v59_v32 }
 0x220   :  { %s78_s13 = spop %77 }
 0x221   :  { %v61_v33 = vstv %s78_s13 }
 0x222   :  { %62 = vst [vmem:[#allocation2] sm:$0xff] %v61_v33 }
 0x223   :  { %99 = shalt.err (!%p96_p4)
}
 0x224   :  { %s100_s17 = scalar_lea.hbm %s152_s2, 128 }
 0x225   :  { %p101_p5 = scmp.ne.s32.totalorder %s152_s2, %s100_s17  ;;  %p104_p6 = scmp.lt.u32.totalorder %s100_s17, %s152_s2 }
 0x227   :  { %p106_p7 = pnand %p104_p6, %p101_p5 }
 0x229   :  { %109 = shalt.err (!%p106_p7)
}
 0x22a   :  { %72 = dma.vmem_to_hbm [thread:$0]  %s70_s1, 128, %s152_s2, [#allocation3]  }
 0x22b   :  { %110 = dma.done.wait [#allocation3], 128  }
 0x22c   :  { %111 = vsyncadd [#allocation3], 4294967168 }
 0x22d   :  { %76 = vsyncpa [#allocation3], 1 }

</bundles_post_ra>
